<compile_context>
chip_gen: v7x
topology: tpu7x:2x2x1
jax: 0.10.0
libtpu: 0.0.40
codegen_flags: <defaults>
</compile_context>

<pallas_src>
import math
import functools

import jax
import jax.numpy as jnp
from jax.experimental import pallas as pl
from jax.experimental.pallas import tpu as pltpu


def _round_up(v, m):
    return (v + m - 1) // m * m


def gauss_params(sigma):
    """Static (trace-time) kernel size + separable 1-D tap weights.

    Matches GaussFilter.make_kernel:
        plane[dy, dx] = 1/(pi*ss) * exp(-((dy-pad)^2 + (dx-pad)^2) / ss)
                      = wv[dy] * wh[dx]
    with the 1/(pi*ss) normalisation folded into the vertical profile.
    """
    ks = math.ceil(6 * sigma)
    ks += 1 - ks % 2
    pad = ks // 2
    ss = 2.0 * float(sigma) ** 2
    wv = tuple(math.exp(-(i - pad) ** 2 / ss) / (math.pi * ss) for i in range(ks))
    wh = tuple(math.exp(-(i - pad) ** 2 / ss) for i in range(ks))
    return ks, pad, wv, wh


def _gauss_sep_kernel(x_ref, o_ref, *, wv, wh, h, pad, w_out):
    # x_ref: (h + 2*pad, wpi) zero-padded single channel plane (VMEM), where
    #        column c of x_ref == padded column c (pad zeros on the left,
    #        >= pad zeros on the right, lane-padded to a multiple of 128).
    # o_ref: (h, w_out) output plane; columns [0, w) hold the valid result.

    # ---- vertical 1-D pass (sublane-offset Ref slices, symmetric pairing) ----
    tmp = wv[pad] * x_ref[pad:pad + h, :].astype(jnp.float32)
    for d in range(1, pad + 1):
        tmp = tmp + wv[pad + d] * (
            x_ref[pad - d:pad - d + h, :].astype(jnp.float32)
            + x_ref[pad + d:pad + d + h, :].astype(jnp.float32))

    # ---- horizontal 1-D pass (static lane-offset slices, symmetric pairing) ----
    acc = wh[pad] * tmp[:, pad:pad + w_out]
    for d in range(1, pad + 1):
        acc = acc + wh[pad + d] * (
            tmp[:, pad - d:pad - d + w_out] + tmp[:, pad + d:pad + d + w_out])

    o_ref[...] = acc.astype(o_ref.dtype)


def gauss_filter(x, sigma):
    """Equivalent of GaussFilter(sigma).forward(x) for NCHW input."""
    if sigma <= 0:
        return x  # _noop branch

    ks, pad, wv, wh = gauss_params(sigma)
    n, c, h, w = x.shape
    assert c == 3, "GaussFilter expects 3-channel (RGB) input"

    # Lane-dense output width and input width wide enough that every
    # horizontal tap slice [dx, dx + w_out) stays in range for dx in [0, 2*pad].
    w_out = _round_up(w, 128)
    wpi = _round_up(w_out + 2 * pad, 128)
    hp = h + 2 * pad
    x_pad = jnp.pad(x, ((0, 0), (0, 0), (pad, pad), (pad, wpi - w - pad)))

    kern = functools.partial(_gauss_sep_kernel, wv=wv, wh=wh, h=h, pad=pad,
                             w_out=w_out)

    flops = 2 * (2 * ks) * n * c * h * w_out
    bytes_accessed = (n * c * hp * wpi + n * c * h * w_out) * x.dtype.itemsize

    # TODO(synk): for very large images, tile H (pad-row halo via pl.Element /
    # manual DMA) so one plane block fits the v7x (64 MiB) / default scoped
    # VMEM budget; whole-plane-per-channel blocks are fine at these sizes.
    out_padded = pl.pallas_call(
        kern,
        out_shape=jax.ShapeDtypeStruct((n, c, h, w_out), x.dtype),
        grid=(n, c),
        in_specs=[
            pl.BlockSpec((None, None, hp, wpi), lambda i, j: (i, j, 0, 0)),
        ],
        out_specs=pl.BlockSpec((None, None, h, w_out), lambda i, j: (i, j, 0, 0)),
        compiler_params=pltpu.CompilerParams(
            dimension_semantics=("parallel", "parallel")),
        cost_estimate=pl.CostEstimate(
            flops=flops, transcendentals=0, bytes_accessed=bytes_accessed),
    )(x_pad)

    # Valid output columns are [0, w) of the lane-padded plane.
    return out_padded[..., :w]


def make_gauss_kernel_ref(sigma):
    """jnp re-implementation of GaussFilter.make_kernel (reference check only)."""
    ks = math.ceil(6 * sigma)
    ks += 1 - ks % 2
    ss = 2.0 * sigma ** 2
    idx = jnp.arange(-(ks // 2), ks // 2 + 1, dtype=jnp.float32)
    h2 = idx[None, :] ** 2
    v2 = h2.T
    plane = (1.0 / (math.pi * ss)) * jnp.exp(-(v2 + h2) / ss)
    zeros = jnp.zeros((ks, ks), jnp.float32)
    gk_r = jnp.stack([plane, zeros, zeros])
    gk_g = jnp.stack([zeros, plane, zeros])
    gk_b = jnp.stack([zeros, zeros, plane])
    return jnp.stack([gk_r, gk_g, gk_b]), ks


if __name__ == "__main__":
    sigma = 1.0
    key = jax.random.PRNGKey(0)
    x = jax.random.normal(key, (2, 3, 16, 16), dtype=jnp.float32)

    out = jax.block_until_ready(gauss_filter(x, sigma))

    # Reference: XLA conv with the module's full diagonal weight / padding
    # (PyTorch F.conv2d cross-correlation semantics, NCHW / OIHW).
    k, ks = make_gauss_kernel_ref(sigma)
    pad = ks // 2
    ref = jax.lax.conv_general_dilated(
        x, k, window_strides=(1, 1),
        padding=[(pad, pad), (pad, pad)],
        dimension_numbers=("NCHW", "OIHW", "NCHW"))
    ref = jax.block_until_ready(ref)

    assert out.shape == ref.shape == (2, 3, 16, 16)
    max_err = float(jnp.max(jnp.abs(out - ref)))
    assert jnp.allclose(out, ref, atol=1e-4, rtol=1e-4), max_err

    # sigma <= 0 noop branch
    out0 = jax.block_until_ready(gauss_filter(x, 0.0))
    assert jnp.array_equal(out0, x)

    print("KERNEL_OK")
</pallas_src>

<mosaic_0001>
module attributes {stable_mosaic.version = 11 : i64} {
  func.func @_gauss_sep_kernel(%arg0: i32, %arg1: i32, %arg2: memref<1x1x22x256xf32, #tpu.memory_space<vmem>>, %arg3: memref<1x1x16x128xf32, #tpu.memory_space<vmem>>) attributes {dimension_semantics = [#tpu.dimension_semantics<parallel>, #tpu.dimension_semantics<parallel>], iteration_bounds = array<i64: 2, 3>, scalar_prefetch = 0 : i64, scratch_operands = 0 : i64, tpu.core_type = #tpu.core_type<tc>, window_params = [{transform_indices = @transform_0, window_bounds = array<i64: 1, 1, 22, 256>}, {transform_indices = @transform_1, window_bounds = array<i64: 1, 1, 16, 128>}]} {
    %c0 = arith.constant 0 : index
    %c0_0 = arith.constant 0 : index
    %c3 = arith.constant 3 : index
    %c0_1 = arith.constant 0 : index
    %0 = vector.load %arg2[%c0, %c0_0, %c3, %c0_1] : memref<1x1x22x256xf32, #tpu.memory_space<vmem>>, vector<1x1x16x256xf32>
    %1 = vector.shape_cast %0 : vector<1x1x16x256xf32> to vector<16x256xf32>
    %cst = arith.constant 0.159154937 : f32
    %2 = vector.broadcast %cst : f32 to vector<16x256xf32>
    %3 = arith.mulf %2, %1 : vector<16x256xf32>
    %c0_2 = arith.constant 0 : index
    %c0_3 = arith.constant 0 : index
    %c2 = arith.constant 2 : index
    %c0_4 = arith.constant 0 : index
    %4 = vector.load %arg2[%c0_2, %c0_3, %c2, %c0_4] : memref<1x1x22x256xf32, #tpu.memory_space<vmem>>, vector<1x1x16x256xf32>
    %5 = vector.shape_cast %4 : vector<1x1x16x256xf32> to vector<16x256xf32>
    %c0_5 = arith.constant 0 : index
    %c0_6 = arith.constant 0 : index
    %c4 = arith.constant 4 : index
    %c0_7 = arith.constant 0 : index
    %6 = vector.load %arg2[%c0_5, %c0_6, %c4, %c0_7] : memref<1x1x22x256xf32, #tpu.memory_space<vmem>>, vector<1x1x16x256xf32>
    %7 = vector.shape_cast %6 : vector<1x1x16x256xf32> to vector<16x256xf32>
    %8 = arith.addf %5, %7 : vector<16x256xf32>
    %cst_8 = arith.constant 0.0965323522 : f32
    %9 = vector.broadcast %cst_8 : f32 to vector<16x256xf32>
    %10 = arith.mulf %9, %8 : vector<16x256xf32>
    %11 = arith.addf %3, %10 : vector<16x256xf32>
    %c0_9 = arith.constant 0 : index
    %c0_10 = arith.constant 0 : index
    %c1 = arith.constant 1 : index
    %c0_11 = arith.constant 0 : index
    %12 = vector.load %arg2[%c0_9, %c0_10, %c1, %c0_11] : memref<1x1x22x256xf32, #tpu.memory_space<vmem>>, vector<1x1x16x256xf32>
    %13 = vector.shape_cast %12 : vector<1x1x16x256xf32> to vector<16x256xf32>
    %c0_12 = arith.constant 0 : index
    %c0_13 = arith.constant 0 : index
    %c5 = arith.constant 5 : index
    %c0_14 = arith.constant 0 : index
    %14 = vector.load %arg2[%c0_12, %c0_13, %c5, %c0_14] : memref<1x1x22x256xf32, #tpu.memory_space<vmem>>, vector<1x1x16x256xf32>
    %15 = vector.shape_cast %14 : vector<1x1x16x256xf32> to vector<16x256xf32>
    %16 = arith.addf %13, %15 : vector<16x256xf32>
    %cst_15 = arith.constant 0.0215392802 : f32
    %17 = vector.broadcast %cst_15 : f32 to vector<16x256xf32>
    %18 = arith.mulf %17, %16 : vector<16x256xf32>
    %19 = arith.addf %11, %18 : vector<16x256xf32>
    %c0_16 = arith.constant 0 : index
    %c0_17 = arith.constant 0 : index
    %c0_18 = arith.constant 0 : index
    %c0_19 = arith.constant 0 : index
    %20 = vector.load %arg2[%c0_16, %c0_17, %c0_18, %c0_19] : memref<1x1x22x256xf32, #tpu.memory_space<vmem>>, vector<1x1x16x256xf32>
    %21 = vector.shape_cast %20 : vector<1x1x16x256xf32> to vector<16x256xf32>
    %c0_20 = arith.constant 0 : index
    %c0_21 = arith.constant 0 : index
    %c6 = arith.constant 6 : index
    %c0_22 = arith.constant 0 : index
    %22 = vector.load %arg2[%c0_20, %c0_21, %c6, %c0_22] : memref<1x1x22x256xf32, #tpu.memory_space<vmem>>, vector<1x1x16x256xf32>
    %23 = vector.shape_cast %22 : vector<1x1x16x256xf32> to vector<16x256xf32>
    %24 = arith.addf %21, %23 : vector<16x256xf32>
    %cst_23 = arith.constant 0.00176805176 : f32
    %25 = vector.broadcast %cst_23 : f32 to vector<16x256xf32>
    %26 = arith.mulf %25, %24 : vector<16x256xf32>
    %27 = arith.addf %19, %26 : vector<16x256xf32>
    %28 = vector.extract_strided_slice %27 {offsets = [0, 3], sizes = [16, 128], strides = [1, 1]} : vector<16x256xf32> to vector<16x128xf32>
    %cst_24 = arith.constant 1.000000e+00 : f32
    %29 = vector.broadcast %cst_24 : f32 to vector<16x128xf32>
    %30 = arith.mulf %29, %28 : vector<16x128xf32>
    %31 = vector.extract_strided_slice %27 {offsets = [0, 2], sizes = [16, 128], strides = [1, 1]} : vector<16x256xf32> to vector<16x128xf32>
    %32 = vector.extract_strided_slice %27 {offsets = [0, 4], sizes = [16, 128], strides = [1, 1]} : vector<16x256xf32> to vector<16x128xf32>
    %33 = arith.addf %31, %32 : vector<16x128xf32>
    %cst_25 = arith.constant 0.606530666 : f32
    %34 = vector.broadcast %cst_25 : f32 to vector<16x128xf32>
    %35 = arith.mulf %34, %33 : vector<16x128xf32>
    %36 = arith.addf %30, %35 : vector<16x128xf32>
    %37 = vector.extract_strided_slice %27 {offsets = [0, 1], sizes = [16, 128], strides = [1, 1]} : vector<16x256xf32> to vector<16x128xf32>
    %38 = vector.extract_strided_slice %27 {offsets = [0, 5], sizes = [16, 128], strides = [1, 1]} : vector<16x256xf32> to vector<16x128xf32>
    %39 = arith.addf %37, %38 : vector<16x128xf32>
    %cst_26 = arith.constant 0.135335281 : f32
    %40 = vector.broadcast %cst_26 : f32 to vector<16x128xf32>
    %41 = arith.mulf %40, %39 : vector<16x128xf32>
    %42 = arith.addf %36, %41 : vector<16x128xf32>
    %43 = vector.extract_strided_slice %27 {offsets = [0, 0], sizes = [16, 128], strides = [1, 1]} : vector<16x256xf32> to vector<16x128xf32>
    %44 = vector.extract_strided_slice %27 {offsets = [0, 6], sizes = [16, 128], strides = [1, 1]} : vector<16x256xf32> to vector<16x128xf32>
    %45 = arith.addf %43, %44 : vector<16x128xf32>
    %cst_27 = arith.constant 0.0111089963 : f32
    %46 = vector.broadcast %cst_27 : f32 to vector<16x128xf32>
    %47 = arith.mulf %46, %45 : vector<16x128xf32>
    %48 = arith.addf %42, %47 : vector<16x128xf32>
    %c0_28 = arith.constant 0 : index
    %c0_29 = arith.constant 0 : index
    %c0_30 = arith.constant 0 : index
    %c0_31 = arith.constant 0 : index
    %49 = vector.load %arg3[%c0_28, %c0_29, %c0_30, %c0_31] : memref<1x1x16x128xf32, #tpu.memory_space<vmem>>, vector<1x1x16x128xf32>
    %50 = vector.shape_cast %49 : vector<1x1x16x128xf32> to vector<16x128xf32>
    %51 = vector.shape_cast %48 : vector<16x128xf32> to vector<1x1x16x128xf32>
    tpu.vector_store %arg3[%c0_28, %c0_29, %c0_30, %c0_31], %51 {strides = array<i32>} : memref<1x1x16x128xf32, #tpu.memory_space<vmem>>, vector<1x1x16x128xf32>,
    return
  }
  func.func @transform_0(%arg0: i32, %arg1: i32) -> (i32, i32, i32, i32) {
    %c0_i32 = arith.constant 0 : i32
    %c0_i32_0 = arith.constant 0 : i32
    %c0_i32_1 = arith.constant 0 : i32
    return %arg0, %arg1, %c0_i32, %c0_i32_0 : i32, i32, i32, i32
  }
  func.func @transform_1(%arg0: i32, %arg1: i32) -> (i32, i32, i32, i32) {
    %c0_i32 = arith.constant 0 : i32
    %c0_i32_0 = arith.constant 0 : i32
    %c0_i32_1 = arith.constant 0 : i32
    return %arg0, %arg1, %c0_i32, %c0_i32_0 : i32, i32, i32, i32
  }
}

</mosaic_0001>

<bundles_post_ra>
// kernel: tpu_custom_call.1
= control target key start
LH: loop header
LB: loop body
LE: loop exit
PB: predicated region body
PF: predicated region fallthrough
CT: control target
= control target key end

     0   :  { %6 = vsyncpa [#allocation3], 0  ;;  %s1250_s0 = inlined_call_operand.vmem [shape: f32[2,3,22,256], index: 0, kind: input, shape index: {}]   ;;  %s1251_s1 = inlined_call_operand.hbm [shape: f32[2,3,16,128], index: 1, kind: output, shape index: {}]  }
   0x1   :  { %8 = vsyncpa [#allocation3 + $0x1], 0  ;;  %s877_s6 = smov 0   ;;  %s879_s7 = smov 0  }
   0x2   :  { %s881_s8 = smov 0   ;;  %s883_s9 = smov 0  }
   0x3   :  { %s885_s10 = smov 0   ;;  %s887_s11 = smov 0  }
   0x4   :  { %s889_s12 = smov 0   ;;  %s891_s13 = smov 0  }
   0x5 LB: > { %s666_s14 = sadd.s32 4294967295, %s855_s13   ;;  %s667_s15 = sadd.s32 4294967294, %s855_s13   ;;  %s855_s13 = sphi %s891_s13, %s14_s13   ;;  %s851_s12 = sphi %s889_s12, %s1260_s12   ;;  %s847_s11 = sphi %s887_s11, %s1259_s11   ;;  %s843_s10 = sphi %s885_s10, %s1258_s10   ;;  %s839_s9 = sphi %s883_s9, %s1257_s9   ;;  %s835_s8 = sphi %s881_s8, %s1256_s8   ;;  %s831_s7 = sphi %s879_s7, %s1255_s7   ;;  %s827_s6 = sphi %s877_s6, %s1254_s6  }
   0x6   : > { %s23_s16 = sadd.s32 1, %s847_s11  ;;  %s26_s17 = sadd.s32 1, %s851_s12 }
   0x7   : > { %p24_p0 = scmp.ge.s32.totalorder %s23_s16, 3  ;;  %p73_p1 = scmp.ne.s32.totalorder %s835_s8, %s831_s7 }
   0x8   : > { %p74_p2 = scmp.eq.s32.totalorder %s666_s14, 5  ;;  %p79_p5 = scmp.ne.s32.totalorder %s831_s7, %s827_s6 }
   0x9   : > { %s1262_s16 = smov (%p24_p0, %s23_s16), 0  ;;  %s1264_s17 = smov (!%p24_p0, %s26_s17), %s851_s12 }
   0xa   : > { %s59_s18 = ssub.s32 %s847_s11, %s1262_s16  ;;  %p928_p3 = por %p74_p2, %p73_p1 }
   0xb   : > { %p28_p4 = scmp.ge.s32.totalorder %s1264_s17, 2  ;;  %p80_p6 = scmp.eq.s32.totalorder %s667_s15, 5 }
   0xc   : > { %p670_p7 = scmp.ge.s32.totalorder %s855_s13, 1  ;;  %p110_p9 = scmp.lt.s32.totalorder %s855_s13, 7 }
   0xd   : > { %s1266_s17 = smov (%p28_p4, %s1264_s17), 0  ;;  %p937_p8 = por %p80_p6, %p79_p5 }
   0xe   : > { %s58_s21 = ssub.s32 %s851_s12, %s1266_s17  ;;  %s63_s22 = sadd.s32 1, %s835_s8 }
   0xf   : > { %s60_s23 = sor.u32 %s59_s18, %s58_s21  ;;  %p111_p10 = pnand %p670_p7, %p110_p9 }
  0x10   : > { %p61_p11 = scmp.eq.s32.totalorder %s60_s23, 0  ;;  %p134_p12 = scmp.lt.s32.totalorder (!%p111_p10), %s843_s10, 1  ;;  %vm169_vm0 = vcmask (!%p111_p10), 1045504   ;;  %vm239_vm1 = vcmask (!%p111_p10), 1043456   ;;  %vm274_vm2 = vcmask (!%p111_p10), 1041408   ;;  %vm204_vm3 = vcmask (!%p111_p10), 1040384  }
  0x11   : > { %114 = sbr.rel (%p111_p10) target bundleno = 455 (0x1c7), region = 24  ;;  %p136_p13 = scmp.lt.s32.totalorder (!%p111_p10), %s839_s9, 2  ;;  %vm333_vm4 = vcmask (!%p111_p10), 1042432   ;;  %vm370_vm5 = vcmask (!%p111_p10), 1031168   ;;  %vm438_vm6 = vcmask (!%p111_p10), 1014784   ;;  %vm506_vm7 = vcmask (!%p111_p10), 998400  }
  0x12   : > { %s946_s24 = scalar_select %p61_p11, %s835_s8, %s63_s22  }
  0x13   : > { %s857_s5 = smov (!%p111_p10), 124   ;;  %s858_s14 = smov (!%p111_p10), 122   ;;  %vm410_vm8 = vcmask (!%p111_p10), 7168   ;;  %vm478_vm9 = vcmask (!%p111_p10), 15360   ;;  %vm555_vm10 = vcmask (!%p111_p10), 1022976  }
  0x14   : > { %s859_s15 = smov (!%p111_p10), 126   ;;  %s860_s18 = smov (!%p111_p10), 1  }
  0x15   : > { %s861_s21 = smov (!%p111_p10), 2   ;;  %s862_s22 = smov (!%p111_p10), 3  }
  0x16   : > { %s863_s23 = smov (!%p111_p10), 125  }
  0x18   : > { %s135_s25 = scalar_select %p134_p12, %s843_s10, 1 }
  0x19   : > { %s137_s26 = scalar_select %p136_p13, %s839_s9, 2 }
  0x1a   : > { %s679_s27 = smul.u32 18, %s135_s25  ;;  %s131_s25 = sand.u32 1, %s831_s7  }
  0x1b   : > { %s678_s28 = smul.u32 6, %s137_s26  ;;  %s671_s26 = sshll.u32 %s131_s25, 4 }
  0x1d   : > { %s140_s29 = sadd.s32 %s679_s27, %s678_s28  ;;  %s133_s27 = scalar_lea.vmem [#allocation2], %s671_s26 }
  0x1e   : > { %s672_s30 = sshll.u32 %s140_s29, 3  ;;  %s680_s28 = smul.u32 6, %s843_s10 }
  0x1f   : > { %s955_s4 = scalar_lea.vmem %s1250_s0, %s672_s30  ;;  %s674_s29 = sshll.u32 %s839_s9, 1 }
  0x20   : > { %v144_v0 = vld [vmem:[%s955_s4 + $0x8] sm:$0xf8]  ;;  %v959_v1 = vld [vmem:[%s955_s4 + $0x10] sm:$0xff]  ;;  %v962_v2 = vld [vmem:[%s955_s4 + $0x18] sm:$0xff]  ;;  %s578_s30 = sadd.s32 %s680_s28, %s674_s29  ;;  %s581_s2 = sshll.u32 %s133_s27, 4  ;;  %s1190_s2 = int_to_ptr.vmem [resolvable:$true] %s581_s2 }
  0x21   : > { %v150_v3 = vmul.f32 0.15915494, %v144_v0  ;;  %v156_v4 = vld [vmem:[%s955_s4 + $0x8] sm:$0xfc]  ;;  %v967_v6 = vld [vmem:[%s955_s4 + $0x20] sm:$0xf] }
  0x22   : > { %v160_v5 = vld [vmem:[%s955_s4 + $0x8] sm:$0xf0]  ;;  %v171_v7 = vrot.slane %v959_v1, 2  ;;  %v174_v9 = vrot.slane %v962_v2, 2  ;;  %v176_v10 = vrot.slane %v967_v6, 2  ;;  %v244_v13 = vrot.slane %v962_v2, 4 }
  0x23   : > { %v173_v8 = vrot.slane %v160_v5, 2  ;;  %v228_v11 = vld [vmem:[%s955_s4 + $0x8] sm:$0xfe]  ;;  %v979_v15 = vld [vmem:[%s955_s4 + $0x20] sm:$0x1f]  ;;  %v241_v16 = vrot.slane %v959_v1, 4 }
  0x24   : > { %v232_v12 = vld [vmem:[%s955_s4 + $0x8] sm:$0xe0]  ;;  %v177_v19 = vsel %vm169_vm0, %v171_v7, %v176_v10  ;;  %v246_v21 = vrot.slane %v979_v15, 4  ;;  %v143_v23 = vld [vmem:[%s955_s4] sm:$0xf8]  ;;  %v311_v26 = vrot.slane %v962_v2, 6 }
  0x25   : > { %v175_v14 = vsel %vm169_vm0, %v173_v8, %v174_v9  ;;  %v243_v17 = vrot.slane %v232_v12, 4  ;;  %v300_v18 = vld [vmem:[%s955_s4 + $0x8] sm:$0xc0]  ;;  %v149_v27 = vmul.f32 0.15915494, %v143_v23  ;;  %v188_v29 = vadd.f32 %v177_v19, %v959_v1  ;;  %v297_v45 = vld [vmem:[%s955_s4] sm:$0xff] }
  0x26   : > { %v187_v20 = vadd.f32 %v175_v14, %v156_v4  ;;  %v310_v22 = vrot.slane %v300_v18, 6  ;;  %v298_v25 = vld [vmem:[%s955_s4 + $0x8] sm:$0xff]  ;;  %v159_v28 = vld [vmem:[%s955_s4] sm:$0xf0]  ;;  %v247_v31 = vsel %vm239_vm1, %v241_v16, %v246_v21  ;;  %v308_v38 = vrot.slane %v959_v1, 6  ;;  %s675_s3 = sshll.u32 %s578_s30, 7 }
  0x27   : > { %v245_v24 = vsel %vm239_vm1, %v243_v17, %v244_v13  ;;  %v155_v33 = vld [vmem:[%s955_s4] sm:$0xfc]  ;;  %v170_v34 = vrot.slane %v159_v28, 2  ;;  %v258_v39 = vadd.f32 %v247_v31, %v959_v1  ;;  %v151_v49 = vmul.f32 0.15915494, %v959_v1  ;;  %s1198_s9 = scalar_lea.sflag [#allocation3], %s131_s25 }
  0x28   : > { %v995_v30 = vmul.f32 0.09653235, %v187_v20  ;;  %v257_v32 = vadd.f32 %v245_v24, %v228_v11  ;;  %v312_v35 = vsel %vm274_vm2, %v310_v22, %v311_v26  ;;  %v231_v36 = vld [vmem:[%s955_s4] sm:$0xe0]  ;;  %v1021_v54 = vmul.f32 0.09653235, %v188_v29 }
  0x29   : > { %v299_v37 = vld [vmem:[%s955_s4] sm:$0xc0]  ;;  %v322_v42 = vadd.f32 %v312_v35, %v298_v25  ;;  %v172_v43 = vsel %vm169_vm0, %v170_v34, %v171_v7  ;;  %v240_v47 = vrot.slane %v231_v36, 4  ;;  %v301_v50 = vld [vmem:[%s955_s4 + $0x20] sm:$0x3f]  ;;  %s761_s10 = scalar_lea.vmem %s1190_s2, 256 }
  0x2a   : > { %v206_v40 = vrot.slane %v995_v30, 7  ;;  %v1009_v41 = vmul.f32 0.02153928, %v257_v32  ;;  %v227_v44 = vld [vmem:[%s955_s4] sm:$0xfe]  ;;  %v186_v46 = vadd.f32 %v172_v43, %v155_v33  ;;  %v307_v48 = vrot.slane %v299_v37, 6  ;;  %p762_p0 = scmp.ne.s32.totalorder %s1190_s2, %s761_s10 }
  0x2b   : > { %v1019_v53 = vmul.f32 0.0017680518, %v322_v42  ;;  %v242_v56 = vsel %vm239_vm1, %v240_v47, %v241_v16  ;;  %v1025_v58 = vmul.f32 0.02153928, %v258_v39  ;;  %v162_v59 = vld [vmem:[%s955_s4 + $0x28] sm:$0xf] }
  0x2c   : > { %v222_v51 = vadd.f32 %v206_v40, %v150_v3  ;;  %v276_v52 = vrot.slane %v1009_v41, 6  ;;  %v192_v55 = vmul.f32 0.09653235, %v186_v46  ;;  %v309_v57 = vsel %vm274_vm2, %v307_v48, %v308_v38  ;;  %v234_v0 = vld [vmem:[%s955_s4 + $0x28] sm:$0x1f]  ;;  %p763_p1 = pnand %p762_p0, %p928_p3 }
  0x2d   : > { %v335_v61 = vrot.slane %v1019_v53, 5  ;;  %v256_v62 = vadd.f32 %v242_v56, %v227_v44  ;;  %v321_v63 = vadd.f32 %v309_v57, %v297_v45  ;;  %v302_v3 = vld [vmem:[%s955_s4 + $0x28] sm:$0x3f]  ;;  %v207_v5 = vrot.slane %v1021_v54, 7  ;;  %v147_v39 = vld [vmem:[%s955_s4 + $0x20] sm:$0x7] }
  0x2e   : > { %v292_v60 = vadd.f32 %v276_v52, %v222_v51  ;;  %v205_v4 = vrot.slane %v192_v55, 7  ;;  %v277_v7 = vrot.slane %v1025_v58, 6  ;;  %v313_v8 = vrot.slane %v301_v50, 6  ;;  %v148_v11 = vld [vmem:[%s955_s4 + $0x28] sm:$0x7]  ;;  %p764_p2 = pneg %p763_p1 }
  0x2f   : > { %v262_v14 = vmul.f32 0.02153928, %v256_v62  ;;  %v325_v16 = vmul.f32 0.0017680518, %v321_v63  ;;  %v152_v17 = vmul.f32 0.15915494, %v962_v2 }
  0x30   : > { %v1038_v12 = vadd.f32 %v335_v61, %v292_v60  ;;  %v221_v18 = vadd.f32 %v205_v4, %v149_v27  ;;  %v208_v19 = vsel %vm204_vm3, %v205_v4, %v207_v5  ;;  %v314_v20 = vsel %vm274_vm2, %v308_v38, %v313_v8  ;;  %v158_v27 = vld [vmem:[%s955_s4 + $0x28] sm:$0x3]  ;;  %v157_v44 = vld [vmem:[%s955_s4 + $0x20] sm:$0x3] }
  0x31   : > { %v178_v22 = vrot.slane %v162_v59, 2  ;;  %v275_v23 = vrot.slane %v262_v14, 6  ;;  %v334_v24 = vrot.slane %v325_v16, 5  ;;  %v223_v25 = vadd.f32 %v208_v19, %v151_v49  ;;  %v230_v38 = vld [vmem:[%s955_s4 + $0x28] sm:$0x1] }
  0x32   : > { %428 = vrot.lane.b32.xlu1 %v1038_v12, %s857_s5  ;;  %v323_v28 = vadd.f32 %v314_v20, %v959_v1  ;;  %v248_v31 = vrot.slane %v234_v0, 4  ;;  %v315_v32 = vrot.slane %v302_v3, 6  ;;  %v154_v33 = vmul.f32 0.15915494, %v148_v11  ;;  %v229_v55 = vld [vmem:[%s955_s4 + $0x20] sm:$0x1] }
  0x33   : > { %v179_v29 = vsel %vm169_vm0, %v174_v9, %v178_v22  ;;  %v291_v34 = vadd.f32 %v275_v23, %v221_v18  ;;  %v278_v35 = vsel %vm274_vm2, %v275_v23, %v277_v7  ;;  %v191_v43 = vadd.f32 %v178_v22, %v158_v27 }
  0x34   : > { %v327_v36 = vmul.f32 0.0017680518, %v323_v28  ;;  %v189_v37 = vadd.f32 %v179_v29, %v962_v2  ;;  %v293_v1 = vadd.f32 %v278_v35, %v223_v25  ;;  %v249_v42 = vsel %vm239_vm1, %v244_v13, %v248_v31 }
  0x35   : > { %v316_v9 = vsel %vm274_vm2, %v311_v26, %v315_v32  ;;  %v1065_v45 = vadd.f32 %v334_v24, %v291_v34  ;;  %v259_v48 = vadd.f32 %v249_v42, %v962_v2  ;;  %v197_v50 = vmul.f32 0.09653235, %v191_v43 }
  0x36   : > { %496 = vrot.lane.b32.xlu1 %v1038_v12, %s858_s14  ;;  %v336_v46 = vrot.slane %v327_v36, 5  ;;  %v195_v47 = vmul.f32 0.09653235, %v189_v37  ;;  %v324_v49 = vadd.f32 %v316_v9, %v962_v2  ;;  %v261_v13 = vadd.f32 %v248_v31, %v230_v38 }
  0x37   : > { %v153_v51 = vmul.f32 0.15915494, %v147_v39  ;;  %358 = vrot.lane.b32.xlu0 %v1065_v45, %s859_s15  ;;  %v265_v57 = vmul.f32 0.02153928, %v259_v48  ;;  %v190_v59 = vadd.f32 %v176_v10, %v157_v44  ;;  %v213_v63 = vrot.slane %v197_v50, 7 }
  0x38   : > { %v337_v26 = vsel %vm333_vm4, %v334_v24, %v336_v46  ;;  %v209_v56 = vrot.slane %v195_v47, 7  ;;  %v328_v62 = vmul.f32 0.0017680518, %v324_v49  ;;  %v267_v2 = vmul.f32 0.02153928, %v261_v13 }
  0x39   : > { %v1077_v60 = vadd.f32 %v337_v26, %v293_v1  ;;  %v279_v3 = vrot.slane %v265_v57, 6  ;;  %v196_v4 = vmul.f32 0.09653235, %v190_v59  ;;  %v260_v8 = vadd.f32 %v246_v21, %v229_v55 }
  0x3a   : > { %v210_v0 = vsel %vm204_vm3, %v206_v40, %v209_v56  ;;  %v338_v6 = vrot.slane %v328_v62, 5  ;;  %v214_v10 = vsel %vm204_vm3, %v209_v56, %v213_v63  ;;  %v283_v14 = vrot.slane %v267_v2, 6 }
  0x3b   : > { %362 = vrot.lane.b32.xlu1 %v1077_v60, %s859_s15  ;;  %v224_v11 = vadd.f32 %v210_v0, %v152_v17  ;;  %360 = vrot.lane.b32.xlu0 %v1038_v12, %s859_s15  ;;  %v280_v30 = vsel %vm274_vm2, %v276_v52, %v279_v3  ;;  %v226_v40 = vadd.f32 %v214_v10, %v154_v33  ;;  %v211_v16 = vrot.slane %v196_v4, 7 }
  0x3c   : > { %v266_v18 = vmul.f32 0.02153928, %v260_v8  ;;  %v339_v21 = vsel %vm333_vm4, %v335_v61, %v338_v6  ;;  %v284_v17 = vsel %vm274_vm2, %v279_v3, %v283_v14 }
  0x3d   : > { %v294_v15 = vadd.f32 %v280_v30, %v224_v11  ;;  %v296_v19 = vadd.f32 %v284_v17, %v226_v40  ;;  %v212_v20 = vsel %vm204_vm3, %v207_v5, %v211_v16 }
  0x3e   : > { %v281_v22 = vrot.slane %v266_v18, 6  ;;  %v225_v41 = vadd.f32 %v212_v20, %v153_v51 }
  0x3f   : > { %v1099_v23 = vadd.f32 %v339_v21, %v294_v15  ;;  %426 = vrot.lane.b32.xlu0 %v1065_v45, %s857_s5  ;;  %v1108_v53 = vadd.f32 %v338_v6, %v296_v19 }
  0x40   : > { %v282_v52 = vsel %vm274_vm2, %v277_v7, %v281_v22 }
  0x41   : > { %364 = vrot.lane.b32.xlu1 %v1099_v23, %s859_s15  ;;  %v295_v61 = vadd.f32 %v282_v52, %v225_v41 }
  0x43   : > { %494 = vrot.lane.b32.xlu0 %v1065_v45, %s858_s14  ;;  %v1112_v54 = vadd.f32 %v336_v46, %v295_v61 }
  0x45   : > { %368 = vrot.lane.b32.xlu1 %v1108_v53, %s859_s15 }
  0x47   : > { %366 = vrot.lane.b32.xlu0 %v1112_v54, %s859_s15  ;;  %s864_s15 = smov [#allocation2]  }
  0x49   : > { %432 = vrot.lane.b32.xlu1 %v1099_v23, %s857_s5 }
  0x4b   : > { %430 = vrot.lane.b32.xlu0 %v1077_v60, %s857_s5 }
  0x4d   : > { %436 = vrot.lane.b32.xlu1 %v1108_v53, %s857_s5 }
  0x4f   : > { %434 = vrot.lane.b32.xlu0 %v1112_v54, %s857_s5 }
  0x51   : > { %500 = vrot.lane.b32.xlu1 %v1099_v23, %s858_s14 }
  0x53   : > { %498 = vrot.lane.b32.xlu0 %v1077_v60, %s858_s14 }
  0x55   : > { %504 = vrot.lane.b32.xlu1 %v1108_v53, %s858_s14 }
  0x57   : > { %502 = vrot.lane.b32.xlu0 %v1112_v54, %s858_s14  ;;  %s1195_s14 = scalar_lea.hbm %s1251_s1, %s675_s3 }
  0xa4   : > { %v429_v58 = vpop.permute.xlu1 %428 }
  0xa5   : > { %v449_v31 = vadd.f32 %v429_v58, %v1038_v12 }
  0xa7   : > { %v455_v39 = vmul.f32 0.13533528, %v449_v31 }
  0xa8   : > { %v497_v5 = vpop.permute.xlu1 %496 }
  0xa9   : > { %v359_v7 = vpop.permute.xlu0 %358 }
  0xad   : > { %v363_v24 = vpop.permute.xlu1 %362  ;;  %v361_v25 = vpop.permute.xlu0 %360 }
  0xae   : > { %v371_v28 = vsel %vm370_vm5, %v359_v7, %v361_v25  ;;  %v381_v27 = vadd.f32 %v361_v25, %v1038_v12 }
  0xaf   : > { %v380_v29 = vadd.f32 %v371_v28, %v1065_v45 }
  0xb0   : > { %v387_v32 = vmul.f32 0.60653067, %v381_v27 }
  0xb1   : > { %v386_v33 = vmul.f32 0.60653067, %v380_v29  ;;  %v427_v34 = vpop.permute.xlu0 %426 }
  0xb2   : > { %v439_v35 = vsel %vm438_vm6, %v427_v34, %v429_v58  ;;  %400 = vrot.lane.b32.xlu1 %v387_v32, %s860_s18 }
  0xb3   : > { %v365_v36 = vpop.permute.xlu1 %364  ;;  %v448_v37 = vadd.f32 %v439_v35, %v1065_v45  ;;  %398 = vrot.lane.b32.xlu0 %v386_v33, %s860_s18 }
  0xb4   : > { %v383_v38 = vadd.f32 %v365_v36, %v1099_v23  ;;  %v372_v9 = vsel %vm370_vm5, %v363_v24, %v365_v36 }
  0xb5   : > { %v454_v1 = vmul.f32 0.13533528, %v448_v37  ;;  %v495_v42 = vpop.permute.xlu0 %494  ;;  %v382_v49 = vadd.f32 %v372_v9, %v1077_v60 }
  0xb6   : > { %v389_v43 = vmul.f32 0.60653067, %v383_v38  ;;  %v507_v44 = vsel %vm506_vm7, %v495_v42, %v497_v5  ;;  %468 = vrot.lane.b32.xlu1 %v455_v39, %s861_s21 }
  0xb7   : > { %v369_v46 = vpop.permute.xlu1 %368  ;;  %v513_v47 = vadd.f32 %v507_v44, %v1065_v45  ;;  %466 = vrot.lane.b32.xlu0 %v454_v1, %s861_s21  ;;  %v388_v57 = vmul.f32 0.60653067, %v382_v49 }
  0xb8   : > { %v385_v48 = vadd.f32 %v369_v46, %v1108_v53 }
  0xb9   : > { %v516_v50 = vmul.f32 0.011108996, %v513_v47  ;;  %v367_v13 = vpop.permute.xlu0 %366 }
  0xba   : > { %v391_v51 = vmul.f32 0.60653067, %v385_v48  ;;  %v373_v55 = vsel %vm370_vm5, %v367_v13, %v369_v46  ;;  %404 = vrot.lane.b32.xlu1 %v389_v43, %s860_s18 }
  0xbb   : > { %v433_v26 = vpop.permute.xlu1 %432  ;;  %522 = vrot.lane.b32.xlu0 %v516_v50, %s862_s22  ;;  %v384_v59 = vadd.f32 %v373_v55, %v1112_v54 }
  0xbc   : > { %v451_v56 = vadd.f32 %v433_v26, %v1099_v23 }
  0xbd   : > { %v431_v62 = vpop.permute.xlu0 %430  ;;  %v390_v4 = vmul.f32 0.60653067, %v384_v59 }
  0xbe   : > { %v457_v63 = vmul.f32 0.13533528, %v451_v56  ;;  %v440_v2 = vsel %vm438_vm6, %v431_v62, %v433_v26  ;;  %408 = vrot.lane.b32.xlu1 %v391_v51, %s860_s18 }
  0xbf   : > { %v437_v0 = vpop.permute.xlu1 %436  ;;  %402 = vrot.lane.b32.xlu0 %v388_v57, %s860_s18  ;;  %v450_v8 = vadd.f32 %v440_v2, %v1077_v60 }
  0xc0   : > { %v453_v3 = vadd.f32 %v437_v0, %v1108_v53 }
  0xc1   : > { %v435_v11 = vpop.permute.xlu0 %434  ;;  %v456_v30 = vmul.f32 0.13533528, %v450_v8 }
  0xc2   : > { %v459_v6 = vmul.f32 0.13533528, %v453_v3  ;;  %v441_v10 = vsel %vm438_vm6, %v435_v11, %v437_v0  ;;  %472 = vrot.lane.b32.xlu1 %v457_v63, %s861_s21 }
  0xc3   : > { %v501_v14 = vpop.permute.xlu1 %500  ;;  %406 = vrot.lane.b32.xlu0 %v390_v4, %s860_s18  ;;  %v452_v40 = vadd.f32 %v441_v10, %v1112_v54  ;;  %s765_s18 = sshll.u32 %s864_s15, 4  ;;  %s766_s18 = int_to_ptr.vmem [resolvable:$false] %s765_s18 }
  0xc4   : > { %p768_p4 = scmp.lt.s32.totalorder %s1190_s2, %s766_s18 }
  0xc5   : > { %v499_v16 = vpop.permute.xlu0 %498  ;;  %v458_v17 = vmul.f32 0.13533528, %v452_v40 }
  0xc6   : > { %v508_v18 = vsel %vm506_vm7, %v499_v16, %v501_v14  ;;  %476 = vrot.lane.b32.xlu1 %v459_v6, %s861_s21 }
  0xc7   : > { %v514_v15 = vadd.f32 %v508_v18, %v1077_v60  ;;  %470 = vrot.lane.b32.xlu0 %v456_v30, %s861_s21  ;;  %v505_v21 = vpop.permute.xlu1 %504 }
  0xc9   : > { %v517_v19 = vmul.f32 0.011108996, %v514_v15  ;;  %v503_v20 = vpop.permute.xlu0 %502 }
  0xca   : > { %v509_v22 = vsel %vm506_vm7, %v503_v20, %v505_v21 }
  0xcb   : > { %v515_v41 = vadd.f32 %v509_v22, %v1112_v54  ;;  %474 = vrot.lane.b32.xlu0 %v458_v17, %s861_s21  ;;  %524 = vrot.lane.b32.xlu1 %v517_v19, %s862_s22  ;;  %s767_s21 = scalar_lea.vmem %s766_s18, 512 }
  0xcc   : > { %p769_p5 = scmp.lt.s32.totalorder %s767_s21, %s761_s10 }
  0xcd   : > { %v518_v52 = vmul.f32 0.011108996, %v515_v41 }
  0xce   : > { %p770_p6 = por %p769_p5, %p768_p4 }
  0xcf   : > { %526 = vrot.lane.b32.xlu0 %v518_v52, %s862_s22 }
  0xd0   : > { %p771_p7 = pnand %p770_p6, %p764_p2 }
 0x124   : > { %v401_v61 = vpop.permute.xlu1 %400 }
 0x125   : > { %v399_v58 = vpop.permute.xlu0 %398 }
 0x126   : > { %v411_v5 = vsel %vm410_vm8, %v399_v58, %v401_v61  ;;  %v420_v28 = vadd.f32 %v399_v58, %v1065_v45 }
 0x127   : > { %v421_v24 = vadd.f32 %v411_v5, %v1038_v12 }
 0x128   : > { %v469_v7 = vpop.permute.xlu1 %468 }
 0x129   : > { %v467_v25 = vpop.permute.xlu0 %466 }
 0x12a   : > { %v479_v27 = vsel %vm478_vm9, %v467_v25, %v469_v7  ;;  %v488_v31 = vadd.f32 %v467_v25, %v420_v28 }
 0x12b   : > { %v489_v29 = vadd.f32 %v479_v27, %v421_v24 }
 0x12c   : > { %v405_v32 = vpop.permute.xlu1 %404 }
 0x12d   : > { %v523_v33 = vpop.permute.xlu0 %522 }
 0x12e   : > { %v531_v34 = vadd.f32 %v523_v33, %v488_v31  ;;  %v532_v35 = vadd.f32 %v523_v33, %v489_v29 }
 0x130   : > { %v409_v36 = vpop.permute.xlu1 %408  ;;  %545 = vrot.lane.b32.xlu0 %v532_v35, %s863_s23  ;;  %543 = vrot.lane.b32.xlu1 %v531_v34, %s863_s23 }
 0x131   : > { %v403_v37 = vpop.permute.xlu0 %402 }
 0x132   : > { %v412_v12 = vsel %vm410_vm8, %v403_v37, %v405_v32  ;;  %v422_v9 = vadd.f32 %v403_v37, %v1077_v60 }
 0x133   : > { %v423_v45 = vadd.f32 %v412_v12, %v1099_v23 }
 0x134   : > { %v473_v38 = vpop.permute.xlu1 %472 }
 0x135   : > { %v407_v39 = vpop.permute.xlu0 %406 }
 0x136   : > { %v413_v43 = vsel %vm410_vm8, %v407_v39, %v409_v36  ;;  %v424_v13 = vadd.f32 %v407_v39, %v1112_v54 }
 0x137   : > { %v425_v48 = vadd.f32 %v413_v43, %v1108_v53 }
 0x138   : > { %v477_v1 = vpop.permute.xlu1 %476 }
 0x139   : > { %v471_v42 = vpop.permute.xlu0 %470 }
 0x13a   : > { %v480_v44 = vsel %vm478_vm9, %v471_v42, %v473_v38  ;;  %v490_v47 = vadd.f32 %v471_v42, %v422_v9 }
 0x13b   : > { %v491_v46 = vadd.f32 %v480_v44, %v423_v45 }
 0x13d   : > { %v525_v49 = vpop.permute.xlu1 %524  ;;  %v475_v50 = vpop.permute.xlu0 %474 }
 0x13e   : > { %v533_v51 = vadd.f32 %v525_v49, %v490_v47  ;;  %v534_v55 = vadd.f32 %v525_v49, %v491_v46  ;;  %v481_v23 = vsel %vm478_vm9, %v475_v50, %v477_v1  ;;  %v492_v56 = vadd.f32 %v475_v50, %v424_v13 }
 0x13f   : > { %v493_v26 = vadd.f32 %v481_v23, %v425_v48 }
 0x140   : > { %547 = vrot.lane.b32.xlu1 %v533_v51, %s863_s23  ;;  %549 = vrot.lane.b32.xlu0 %v534_v55, %s863_s23 }
 0x141   : > { %v527_v60 = vpop.permute.xlu0 %526 }
 0x142   : > { %v535_v57 = vadd.f32 %v527_v60, %v492_v56  ;;  %v536_v59 = vadd.f32 %v527_v60, %v493_v26 }
 0x144   : > { %553 = vrot.lane.b32.xlu0 %v536_v59, %s863_s23  ;;  %551 = vrot.lane.b32.xlu1 %v535_v57, %s863_s23 }
 0x1a2   : > { %v544_v53 = vpop.permute.xlu1 %543  ;;  %v546_v54 = vpop.permute.xlu0 %545 }
 0x1a3   : > { %v556_v62 = vsel %vm555_vm10, %v544_v53, %v546_v54 }
 0x1a4   : > { %562 = vst [vmem:[%s133_s27 - $0x3] sm:$0xf8] %v556_v62 }
 0x1b2   : > { %v548_v63 = vpop.permute.xlu1 %547  ;;  %v550_v2 = vpop.permute.xlu0 %549 }
 0x1b3   : > { %v557_v0 = vsel %vm555_vm10, %v548_v63, %v550_v2 }
 0x1b4   : > { %563 = vst [vmem:[%s133_s27 + $0x5] sm:$0xff] %v557_v0 }
 0x1b6   : > { %v552_v3 = vpop.permute.xlu1 %551  ;;  %v554_v4 = vpop.permute.xlu0 %553 }
 0x1b7   : > { %v558_v8 = vsel %vm555_vm10, %v552_v3, %v554_v4 }
 0x1b8   : > { %564 = vst [vmem:[%s133_s27 + $0xd] sm:$0x7] %v558_v8 }
 0x1b9   : > { %774 = shalt.err (!%p771_p7)
}
 0x1ba   : > { %s775_s22 = scalar_lea.hbm %s1195_s14, 256  ;;  %s779_s26 = scalar_lea.hbm %s1251_s1, 1536 }
 0x1bb   : > { %p776_p9 = scmp.ne.s32.totalorder %s1195_s14, %s775_s22  ;;  %p780_p12 = scmp.lt.u32.totalorder %s1195_s14, %s1251_s1 }
 0x1bc   : > { %p781_p13 = scmp.lt.u32.totalorder %s779_s26, %s775_s22  ;;  %p783_p1 = scmp.lt.u32.totalorder %s775_s22, %s1195_s14 }
 0x1bd   : > { %p777_p10 = pnand %p776_p9, %p928_p3 }
 0x1be   : > { %p782_p0 = por %p781_p13, %p780_p12 }
 0x1bf   : > { %p778_p11 = pneg %p777_p10 }
 0x1c0   : > { %p784_p2 = por %p783_p1, %p782_p0 }
 0x1c2   : > { %p785_p4 = pnand %p784_p2, %p778_p11 }
 0x1c4   : > { %788 = shalt.err (!%p785_p4)
}
 0x1c5   : > { %s865_s29 = smov 128   ;;  %s866_s30 = smov 8  }
 0x1c6   : > { %681 = dma.vmem_to_hbm [thread:$0]  (%p928_p3), %s1190_s2, 256, %s1195_s14, %s1198_s9, %s865_s29, %s865_s29, %s866_s30  }
 0x1c7 PF: > { %p687_p5 = scmp.ge.s32.totalorder %s855_s13, 2  ;;  %s596_s3 = sand.u32 1, %s827_s6  }
 0x1c8   : > { %s597_s4 = scalar_lea.sflag [#allocation3], %s596_s3 }
 0x1c9   : > { %p684_p6 = pnand %p687_p5, %p937_p8 }
 0x1cb   : > { %822 = dma.done.wait (!%p684_p6), %s597_s4, 256  }
 0x1cc   : > { %824 = vsyncadd (!%p684_p6), %s597_s4, 4294967040  ;;  %s14_s13 = sadd.s32 1, %s855_s13   ;;  %s1254_s6 = smov %s831_s7 }
 0x1cd   : > { %p11_p7 = scmp.ge.s32.totalorder %s14_s13, 8   ;;  %s1255_s7 = smov %s835_s8 }
 0x1ce   : > { %s1256_s8 = smov %s946_s24  ;;  %s1257_s9 = smov %s847_s11 }
 0x1cf   : > { %s1258_s10 = smov %s851_s12  ;;  %s1259_s11 = smov %s1262_s16 }
 0x1d0   : > { %s1260_s12 = smov %s1266_s17  ;;  %13 = sbr.rel (!%p11_p7) target bundleno = 5 (0x5), region = 59 }
 0x1d7   :  { %602 = vsyncpa [#allocation3], 1 }
 0x1d8   :  { %604 = vsyncpa [#allocation3 + $0x1], 1 }

</bundles_post_ra>
